<compile_context>
chip_gen: v7x
topology: tpu7x:2x2x1
jax: 0.10.0
libtpu: 0.0.40
codegen_flags: <defaults>
</compile_context>

<pallas_src>
import functools

import jax
import jax.numpy as jnp
from jax import lax
from jax.experimental import pallas as pl
from jax.experimental.pallas import tpu as pltpu


# Contract the last dim of both operands: (TB, K) x (N, K) -> (TB, N).
# This matches nn.Linear's (out, in) weight layout with no transpose pass.
_CONTRACT_LAST = (((1,), (1,)), ((), ()))


def _mlp(pooled, w1_ref, b1_ref, w2_ref, b2_ref, o_ref):
    """dense1 -> (dropout=identity) -> out_proj on a pooled (TB, H) block."""
    h = lax.dot_general(pooled, w1_ref[...],
                        dimension_numbers=_CONTRACT_LAST,
                        preferred_element_type=jnp.float32)
    h = h + b1_ref[...]                                   # (TB, inner)
    # dropout: inference mode -> identity.
    # TODO(synk): training-mode stochastic dropout (pltpu.prng_*) not wired in.
    out = lax.dot_general(h, w2_ref[...],
                          dimension_numbers=_CONTRACT_LAST,
                          preferred_element_type=jnp.float32)
    out = out + b2_ref[...]                               # (TB, C_pad)
    o_ref[...] = out.astype(o_ref.dtype)


def _first_kernel(x_ref, w1_ref, b1_ref, w2_ref, b2_ref, o_ref):
    """x_ref is the already-sliced (TB, H) CLS-token block."""
    _mlp(x_ref[...].astype(jnp.float32), w1_ref, b1_ref, w2_ref, b2_ref, o_ref)


def _mean_kernel(x_ref, w1_ref, b1_ref, w2_ref, b2_ref, o_ref, acc_ref, *, seq_len):
    """Streamed mean over S: f32 accumulation, finalize at the last S step."""
    s = pl.program_id(1)

    @pl.when(s == 0)
    def _():
        acc_ref[...] = jnp.zeros_like(acc_ref)

    # Accumulate the S-chunk sum in f32 (correct even for bf16 hidden states).
    acc_ref[...] += jnp.sum(x_ref[...].astype(jnp.float32), axis=1)

    @pl.when(s == pl.num_programs(1) - 1)
    def _():
        pooled = acc_ref[...] * (1.0 / seq_len)            # (TB, H) f32
        _mlp(pooled, w1_ref, b1_ref, w2_ref, b2_ref, o_ref)


def _pick_tile(dim, max_tile, quantum=8):
    """Largest t <= max_tile with dim % t == 0 and (t == dim or t % quantum == 0)."""
    if dim <= max_tile:
        return dim
    t = (max_tile // quantum) * quantum
    while t >= quantum:
        if dim % t == 0:
            return t
        t -= quantum
    return dim  # fallback: no tiling along this dim (still correct)


def classification_head(last_hidden_states, w1, b1, w2, b2, *, pooling="mean"):
    """Pallas wrapper. Weights follow nn.Linear convention: w1 (inner, H), w2 (C, inner)."""
    B, S, H = last_hidden_states.shape
    inner, in_dim = w1.shape
    assert in_dim == H, "dense1 weight does not match hidden size"
    C = w2.shape[0]
    x_dtype = last_hidden_states.dtype
    itemsize = jnp.dtype(x_dtype).itemsize

    # Lane-dense output: pad out_proj to a multiple of 128 output columns so the
    # final store is an unmasked full-lane vst; sliced back after the call.
    C_pad = 128 * pl.cdiv(C, 128)
    if C_pad != C:
        w2p = jnp.zeros((C_pad, inner), w2.dtype).at[:C, :].set(w2)
        b2p = jnp.zeros((C_pad,), b2.dtype).at[:C].set(b2)
    else:
        w2p, b2p = w2, b2
    b1r = jnp.reshape(b1, (1, inner))
    b2r = jnp.reshape(b2p, (1, C_pad))

    # Batch tile: second-to-last dim of the (TB, C_pad) output block, so it must
    # be 8-aligned or equal to B.
    TB = _pick_tile(B, 128, quantum=8)

    weight_bytes = (w1.size + b1r.size + w2p.size + b2r.size) * jnp.dtype(w1.dtype).itemsize
    flops = 2 * B * (H * inner + inner * C_pad)
    vmem_limit = 32 * 1024 * 1024  # safe on v5e/v6e (128 MiB phys) and v7x (64 MiB phys)

    weight_specs = [
        pl.BlockSpec((inner, H), lambda *idx: (0, 0)),     # dense1 weight (resident)
        pl.BlockSpec((1, inner), lambda *idx: (0, 0)),     # dense1 bias
        pl.BlockSpec((C_pad, inner), lambda *idx: (0, 0)), # out_proj weight (padded)
        pl.BlockSpec((1, C_pad), lambda *idx: (0, 0)),     # out_proj bias (padded)
    ]

    if pooling == "first":
        # Only the s == 0 slab is ever read: slice it in the wrapper so the kernel
        # never touches the other S-1 positions (HBM traffic down by ~S x).
        x0 = last_hidden_states[:, 0, :]                   # (B, H)
        bytes_accessed = B * H * itemsize + weight_bytes + B * C_pad * itemsize
        out_padded = pl.pallas_call(
            _first_kernel,
            out_shape=jax.ShapeDtypeStruct((B, C_pad), x_dtype),
            grid=(pl.cdiv(B, TB),),
            in_specs=[pl.BlockSpec((TB, H), lambda b: (b, 0))] + weight_specs,
            out_specs=pl.BlockSpec((TB, C_pad), lambda b: (b, 0)),
            compiler_params=pltpu.CompilerParams(
                dimension_semantics=("parallel",),
                vmem_limit_bytes=vmem_limit,
            ),
            cost_estimate=pl.CostEstimate(
                flops=flops, transcendentals=0, bytes_accessed=bytes_accessed),
        )(x0, w1, b1r, w2p, b2r)

    elif pooling == "mean":
        # Streamed S reduction: bound the per-step hidden-states block so it
        # double-buffers comfortably within scoped VMEM regardless of S.
        budget = 8 * 1024 * 1024                           # bytes per in-flight x block
        max_ts = max(8, (budget // max(1, TB * H * itemsize)) // 8 * 8)
        TS = _pick_tile(S, max_ts, quantum=8)
        bytes_accessed = B * S * H * itemsize + weight_bytes + B * C_pad * itemsize
        kernel = functools.partial(_mean_kernel, seq_len=float(S))
        out_padded = pl.pallas_call(
            kernel,
            out_shape=jax.ShapeDtypeStruct((B, C_pad), x_dtype),
            grid=(pl.cdiv(B, TB), pl.cdiv(S, TS)),         # S reduction axis innermost
            in_specs=[pl.BlockSpec((TB, TS, H), lambda b, s: (b, s, 0))] + weight_specs,
            out_specs=pl.BlockSpec((TB, C_pad), lambda b, s: (b, 0)),
            scratch_shapes=[pltpu.VMEM((TB, H), jnp.float32)],  # f32 sum accumulator
            compiler_params=pltpu.CompilerParams(
                dimension_semantics=("parallel", "arbitrary"),
                vmem_limit_bytes=vmem_limit,
            ),
            cost_estimate=pl.CostEstimate(
                flops=flops, transcendentals=0, bytes_accessed=bytes_accessed),
        )(last_hidden_states, w1, b1r, w2p, b2r)
    else:
        raise ValueError(f"unsupported pooling: {pooling}")

    return out_padded[:, :C] if C_pad != C else out_padded


def _reference(last_hidden_states, w1, b1, w2, b2, *, pooling):
    if pooling == "first":
        x = last_hidden_states[:, 0, :]
    else:
        x = jnp.mean(last_hidden_states.astype(jnp.float32), axis=1)
    x = x @ w1.T + b1
    x = x @ w2.T + b2
    return x.astype(last_hidden_states.dtype)


def _init_linear(key, out_dim, in_dim):
    # Deterministic nn.Linear-style init: U(-1/sqrt(in_dim), 1/sqrt(in_dim)).
    kw, kb = jax.random.split(key)
    bound = 1.0 / (in_dim ** 0.5)
    w = jax.random.uniform(kw, (out_dim, in_dim), jnp.float32, -bound, bound)
    b = jax.random.uniform(kb, (out_dim,), jnp.float32, -bound, bound)
    return w, b


if __name__ == "__main__":
    # Small shapes consistent with the module's forward:
    #   batch=2, seq=8, input_dim=32, inner_dim=32, num_classes=4
    B, S, H, INNER, C = 2, 8, 32, 32, 4

    key = jax.random.PRNGKey(0)
    kx, k1, k2 = jax.random.split(key, 3)

    last_hidden_states = jax.random.normal(kx, (B, S, H), jnp.float32)
    w1, b1 = _init_linear(k1, INNER, H)   # dense1
    w2, b2 = _init_linear(k2, C, INNER)   # out_proj

    ok = True
    for pooling in ("mean", "first"):
        out = classification_head(last_hidden_states, w1, b1, w2, b2, pooling=pooling)
        out = jax.block_until_ready(out)
        ref = _reference(last_hidden_states, w1, b1, w2, b2, pooling=pooling)
        ok &= bool(jnp.allclose(out, ref, atol=1e-5, rtol=1e-5))

    if ok:
        print("KERNEL_OK")
</pallas_src>

<mosaic_0001>
module attributes {stable_mosaic.version = 11 : i64} {
  func.func @_mean_kernel(%arg0: i32, %arg1: i32, %arg2: memref<2x8x32xf32, #tpu.memory_space<vmem>>, %arg3: memref<32x32xf32, #tpu.memory_space<vmem>>, %arg4: memref<1x32xf32, #tpu.memory_space<vmem>>, %arg5: memref<128x32xf32, #tpu.memory_space<vmem>>, %arg6: memref<1x128xf32, #tpu.memory_space<vmem>>, %arg7: memref<2x128xf32, #tpu.memory_space<vmem>>, %arg8: memref<2x32xf32, #tpu.memory_space<vmem>>) attributes {dimension_semantics = [#tpu.dimension_semantics<parallel>, #tpu.dimension_semantics<arbitrary>], iteration_bounds = array<i64: 1, 1>, scalar_prefetch = 0 : i64, scratch_operands = 1 : i64, tpu.core_type = #tpu.core_type<tc>, window_params = [{transform_indices = @transform_0, window_bounds = array<i64: 2, 8, 32>}, {pipeline_mode = #tpu.pipeline_mode<synchronous>, transform_indices = @transform_1, window_bounds = array<i64: 32, 32>}, {pipeline_mode = #tpu.pipeline_mode<synchronous>, transform_indices = @transform_2, window_bounds = array<i64: 1, 32>}, {pipeline_mode = #tpu.pipeline_mode<synchronous>, transform_indices = @transform_3, window_bounds = array<i64: 128, 32>}, {pipeline_mode = #tpu.pipeline_mode<synchronous>, transform_indices = @transform_4, window_bounds = array<i64: 1, 128>}, {transform_indices = @transform_5, window_bounds = array<i64: 2, 128>}]} {
    %c0_i32 = arith.constant 0 : i32
    %0 = arith.cmpi eq, %arg1, %c0_i32 : i32
    %1 = arith.extui %0 : i1 to i32
    %c0_i32_0 = arith.constant 0 : i32
    %2 = arith.cmpi ne, %1, %c0_i32_0 : i32
    scf.if %2 {
      %cst_9 = arith.constant 0.000000e+00 : f32
      %11 = vector.broadcast %cst_9 : f32 to vector<2x32xf32>
      %c0_10 = arith.constant 0 : index
      %c0_11 = arith.constant 0 : index
      %12 = vector.load %arg8[%c0_10, %c0_11] : memref<2x32xf32, #tpu.memory_space<vmem>>, vector<2x32xf32>
      tpu.vector_store %arg8[%c0_10, %c0_11], %11 {strides = array<i32>} : memref<2x32xf32, #tpu.memory_space<vmem>>, vector<2x32xf32>,
    } else {
    }
    %c0 = arith.constant 0 : index
    %c0_1 = arith.constant 0 : index
    %3 = vector.load %arg8[%c0, %c0_1] : memref<2x32xf32, #tpu.memory_space<vmem>>, vector<2x32xf32>
    %c0_2 = arith.constant 0 : index
    %c0_3 = arith.constant 0 : index
    %c0_4 = arith.constant 0 : index
    %4 = vector.load %arg2[%c0_2, %c0_3, %c0_4] : memref<2x8x32xf32, #tpu.memory_space<vmem>>, vector<2x8x32xf32>
    %cst = arith.constant dense<0.000000e+00> : vector<2x32xf32>
    %5 = vector.multi_reduction <add>, %4, %cst [1] : vector<2x8x32xf32> to vector<2x32xf32>
    %6 = arith.addf %3, %5 : vector<2x32xf32>
    %c0_5 = arith.constant 0 : index
    %c0_6 = arith.constant 0 : index
    %7 = vector.load %arg8[%c0_5, %c0_6] : memref<2x32xf32, #tpu.memory_space<vmem>>, vector<2x32xf32>
    tpu.vector_store %arg8[%c0_5, %c0_6], %6 {strides = array<i32>} : memref<2x32xf32, #tpu.memory_space<vmem>>, vector<2x32xf32>,
    %c0_i32_7 = arith.constant 0 : i32
    %8 = arith.cmpi eq, %arg1, %c0_i32_7 : i32
    %9 = arith.extui %8 : i1 to i32
    %c0_i32_8 = arith.constant 0 : i32
    %10 = arith.cmpi ne, %9, %c0_i32_8 : i32
    scf.if %10 {
      %c0_9 = arith.constant 0 : index
      %c0_10 = arith.constant 0 : index
      %11 = vector.load %arg8[%c0_9, %c0_10] : memref<2x32xf32, #tpu.memory_space<vmem>>, vector<2x32xf32>
      %cst_11 = arith.constant 1.250000e-01 : f32
      %12 = vector.broadcast %cst_11 : f32 to vector<2x32xf32>
      %13 = arith.mulf %11, %12 : vector<2x32xf32>
      %c0_12 = arith.constant 0 : index
      %c0_13 = arith.constant 0 : index
      %14 = vector.load %arg3[%c0_12, %c0_13] : memref<32x32xf32, #tpu.memory_space<vmem>>, vector<32x32xf32>
      %cst_14 = arith.constant dense<0.000000e+00> : vector<2x32xf32>
      %15 = tpu.matmul %13, %14, %cst_14 {dimension_numbers = #tpu.dot_dimension_numbers<[1], [1], [0], [0], [0, 0, 1, 0], [], []>} : vector<2x32xf32>, vector<32x32xf32>, vector<2x32xf32> -> vector<2x32xf32>
      %c0_15 = arith.constant 0 : index
      %c0_16 = arith.constant 0 : index
      %16 = vector.load %arg4[%c0_15, %c0_16] : memref<1x32xf32, #tpu.memory_space<vmem>>, vector<1x32xf32>
      %17 = vector.broadcast %16 : vector<1x32xf32> to vector<2x32xf32>
      %18 = arith.addf %15, %17 : vector<2x32xf32>
      %c0_17 = arith.constant 0 : index
      %c0_18 = arith.constant 0 : index
      %19 = vector.load %arg5[%c0_17, %c0_18] : memref<128x32xf32, #tpu.memory_space<vmem>>, vector<128x32xf32>
      %cst_19 = arith.constant dense<0.000000e+00> : vector<2x128xf32>
      %20 = tpu.matmul %18, %19, %cst_19 {dimension_numbers = #tpu.dot_dimension_numbers<[1], [1], [0], [0], [0, 0, 1, 0], [], []>} : vector<2x32xf32>, vector<128x32xf32>, vector<2x128xf32> -> vector<2x128xf32>
      %c0_20 = arith.constant 0 : index
      %c0_21 = arith.constant 0 : index
      %21 = vector.load %arg6[%c0_20, %c0_21] : memref<1x128xf32, #tpu.memory_space<vmem>>, vector<1x128xf32>
      %22 = vector.broadcast %21 : vector<1x128xf32> to vector<2x128xf32>
      %23 = arith.addf %20, %22 : vector<2x128xf32>
      %c0_22 = arith.constant 0 : index
      %c0_23 = arith.constant 0 : index
      %24 = vector.load %arg7[%c0_22, %c0_23] : memref<2x128xf32, #tpu.memory_space<vmem>>, vector<2x128xf32>
      tpu.vector_store %arg7[%c0_22, %c0_23], %23 {strides = array<i32>} : memref<2x128xf32, #tpu.memory_space<vmem>>, vector<2x128xf32>,
    } else {
    }
    return
  }
  func.func @transform_0(%arg0: i32, %arg1: i32) -> (i32, i32, i32) {
    %c0_i32 = arith.constant 0 : i32
    %c0_i32_0 = arith.constant 0 : i32
    return %arg0, %arg1, %c0_i32 : i32, i32, i32
  }
  func.func @transform_1(%arg0: i32, %arg1: i32) -> (i32, i32) {
    %c0_i32 = arith.constant 0 : i32
    %c0_i32_0 = arith.constant 0 : i32
    %c0_i32_1 = arith.constant 0 : i32
    return %c0_i32, %c0_i32_0 : i32, i32
  }
  func.func @transform_2(%arg0: i32, %arg1: i32) -> (i32, i32) {
    %c0_i32 = arith.constant 0 : i32
    %c0_i32_0 = arith.constant 0 : i32
    %c0_i32_1 = arith.constant 0 : i32
    return %c0_i32, %c0_i32_0 : i32, i32
  }
  func.func @transform_3(%arg0: i32, %arg1: i32) -> (i32, i32) {
    %c0_i32 = arith.constant 0 : i32
    %c0_i32_0 = arith.constant 0 : i32
    %c0_i32_1 = arith.constant 0 : i32
    return %c0_i32, %c0_i32_0 : i32, i32
  }
  func.func @transform_4(%arg0: i32, %arg1: i32) -> (i32, i32) {
    %c0_i32 = arith.constant 0 : i32
    %c0_i32_0 = arith.constant 0 : i32
    %c0_i32_1 = arith.constant 0 : i32
    return %c0_i32, %c0_i32_0 : i32, i32
  }
  func.func @transform_5(%arg0: i32, %arg1: i32) -> (i32, i32) {
    %c0_i32 = arith.constant 0 : i32
    %c0_i32_0 = arith.constant 0 : i32
    return %arg0, %c0_i32 : i32, i32
  }
}

</mosaic_0001>

<bundles_post_ra>
// kernel: tpu_custom_call.1
= control target key start
LH: loop header
LB: loop body
LE: loop exit
PB: predicated region body
PF: predicated region fallthrough
CT: control target
= control target key end

     0   :  { %vm30_vm0 = vcmask 261120   ;;  %vm25_vm1 = vcmask 254976   ;;  %v473_v2 = vmov 0.0|0.0   ;;  %v474_v6 = vmov 0.0   ;;  %s633_s0 = inlined_call_operand.vmem [shape: f32[2,8,32], index: 0, kind: input, shape index: {}]   ;;  %s634_s1 = inlined_call_operand.vmem [shape: f32[32,32], index: 1, kind: input, shape index: {}]   ;;  %s635_s2 = inlined_call_operand.vmem [shape: f32[1,32], index: 2, kind: input, shape index: {}]   ;;  %s636_s3 = inlined_call_operand.vmem [shape: f32[128,32], index: 3, kind: input, shape index: {}]   ;;  %s637_s4 = inlined_call_operand.vmem [shape: f32[1,128], index: 4, kind: input, shape index: {}]   ;;  %s638_s5 = inlined_call_operand.hbm [shape: f32[2,128], index: 5, kind: output, shape index: {}]  }
   0x1   :  { %v58_v0 = vld [vmem:[%s634_s1] sm:$0xff]  ;;  %v59_v1 = vld [vmem:[%s634_s1 + $0x8] sm:$0xff]  ;;  %405 = vmatprep.subr.bf16.mxu0 %v473_v2  ;;  %vm516_vm2 = vmpackc.low %vm30_vm0, %vm30_vm0  ;;  %413 = vmatprep.subr.bf16.mxu1 %v473_v2  ;;  %26 = vst.msk [vmem:[#allocation2] sm:$0x3] %vm25_vm1, %v474_v6  ;;  %vm475_vm3 = vmmov 0  }
   0x2   :  { %v406_v3 = vpack.c.bf16 %v59_v1, %v58_v0  ;;  %v28_v5 = vld [vmem:[%s633_s0] sm:$0xff]  ;;  %v29_v7 = vld [vmem:[%s633_s0 + $0x8] sm:$0xff]  ;;  %367 = vmatprep.mubr.msk.f32.mxu0 %vm475_vm3, %v474_v6  ;;  %402 = vmatprep.mubr.msk.f32.mxu1 %vm475_vm3, %v474_v6  ;;  %v60_v14 = vld [vmem:[%s634_s1 + $0x10] sm:$0xff] }
   0x3   :  { %v31_v8 = vsel %vm30_vm0, %v28_v5, 0.0  ;;  %v154_v9 = vld [vmem:[%s636_s3] sm:$0xff]  ;;  %v155_v10 = vld [vmem:[%s636_s3 + $0x8] sm:$0xff]  ;;  %v38_v12 = vsel %vm30_vm0, %v29_v7, 0.0  ;;  %v61_v15 = vld [vmem:[%s634_s1 + $0x18] sm:$0xff] }
   0x4   :  { %408 = vmatpush3.bf16.xpose.msk.msra.mxu0 %vm516_vm2, %v406_v3  ;;  %v32_v11 = vrot.slane %v31_v8, 4  ;;  %v414_v13 = vpack.c.bf16 %v155_v10, %v154_v9  ;;  %v39_v16 = vrot.slane %v38_v12, 4  ;;  %v156_v19 = vld [vmem:[%s636_s3 + $0x10] sm:$0xff]  ;;  %v157_v20 = vld [vmem:[%s636_s3 + $0x18] sm:$0xff]  ;;  %v410_v21 = vpack.c.bf16 %v61_v15, %v60_v14 }
   0x5   :  { %409 = vmatprep.subr.bf16.mxu0 %v473_v2 }
   0x6   :  { %v33_v17 = vadd.f32 %v32_v11, %v31_v8  ;;  %416 = vmatpush3.bf16.xpose.msk.msra.mxu1 %vm516_vm2, %v414_v13  ;;  %v40_v18 = vadd.f32 %v39_v16, %v38_v12 }
   0x7   :  { %417 = vmatprep.subr.bf16.mxu1 %v473_v2 }
   0x8   :  { %v34_v22 = vrot.slane %v33_v17, 2  ;;  %v41_v23 = vrot.slane %v40_v18, 2 }
   0x9   :  { %10 = vsyncpa [#allocation4], 0  ;;  %v418_v25 = vpack.c.bf16 %v157_v20, %v156_v19  ;;  %vm47_vm4 = vcmask 1041409   ;;  %v27_v30 = vld [vmem:[#allocation2] sm:$0x3]  ;;  %v159_v33 = vld [vmem:[%s636_s3 + $0x28] sm:$0xff] }
   0xa   :  { %v35_v24 = vadd.f32 %v34_v22, %v33_v17  ;;  %v42_v26 = vadd.f32 %v41_v23, %v40_v18  ;;  %v158_v32 = vld [vmem:[%s636_s3 + $0x20] sm:$0xff]  ;;  %v160_v37 = vld [vmem:[%s636_s3 + $0x30] sm:$0xff]  ;;  %v161_v38 = vld [vmem:[%s636_s3 + $0x38] sm:$0xff]  ;;  %s476_s12 = smov [#allocation3]  }
   0xb   :  { %v422_v36 = vpack.c.bf16 %v159_v33, %v158_v32  ;;  %v426_v39 = vpack.c.bf16 %v161_v38, %v160_v37  ;;  %v162_v42 = vld [vmem:[%s636_s3 + $0x40] sm:$0xff]  ;;  %v163_v43 = vld [vmem:[%s636_s3 + $0x48] sm:$0xff]  ;;  %v164_v45 = vld [vmem:[%s636_s3 + $0x50] sm:$0xff]  ;;  %s305_s13 = sshll.u32 %s476_s12, 4  ;;  %s306_s13 = int_to_ptr.vmem [resolvable:$true] %s305_s13 }
   0xc   :  { %412 = vmatpush3.bf16.xpose.msk.msra.mxu0 %vm516_vm2, %v410_v21  ;;  %v36_v27 = vrot.slane %v35_v24, 1  ;;  %v43_v28 = vrot.slane %v42_v26, 1  ;;  %v430_v44 = vpack.c.bf16 %v163_v43, %v162_v42  ;;  %v165_v46 = vld [vmem:[%s636_s3 + $0x58] sm:$0xff]  ;;  %v166_v48 = vld [vmem:[%s636_s3 + $0x60] sm:$0xff]  ;;  %v167_v49 = vld [vmem:[%s636_s3 + $0x68] sm:$0xff]  ;;  %p454_p1 = scmp.lt.s32.totalorder %s306_s13, %s306_s13 }
   0xd   :  { %v434_v47 = vpack.c.bf16 %v165_v46, %v164_v45  ;;  %v438_v50 = vpack.c.bf16 %v167_v49, %v166_v48  ;;  %v168_v51 = vld [vmem:[%s636_s3 + $0x70] sm:$0xff]  ;;  %v169_v52 = vld [vmem:[%s636_s3 + $0x78] sm:$0xff]  ;;  %v313_v54 = vld [vmem:[%s635_s2] ss:$0 sm:$0xff]  ;;  %s449_s3 = scalar_lea.vmem %s306_s13, 32 }
   0xe   :  { %v37_v29 = vadd.f32 %v36_v27, %v35_v24  ;;  %420 = vmatpush3.bf16.xpose.msk.msra.mxu1 %vm516_vm2, %v418_v25  ;;  %v44_v31 = vadd.f32 %v43_v28, %v42_v26  ;;  %v442_v53 = vpack.c.bf16 %v169_v52, %v168_v51  ;;  %v319_v58 = vld [vmem:[%s637_s4] ss:$0 sm:$0xff]  ;;  %p450_p0 = scmp.ne.s32.totalorder %s306_s13, %s449_s3  ;;  %p455_p2 = scmp.lt.s32.totalorder %s449_s3, %s449_s3 }
   0xf   :  { %421 = vmatprep.subr.bf16.mxu1 %v473_v2 }
  0x10   :  { %v48_v34 = vsel %vm47_vm4, %v44_v31, %v37_v29  ;;  %p456_p3 = por %p455_p2, %p454_p1 }
  0x11   :  { %v50_v35 = vadd.f32 %v48_v34, %v27_v30 }
  0x12   :  { %p457_p4 = pnand %p456_p3, %p450_p0 }
  0x13   :  { %52 = vst.msk [vmem:[#allocation2] sm:$0x3] %vm25_vm1, %v50_v35 }
  0x16   :  { %424 = vmatpush3.bf16.xpose.msk.msra.mxu1 %vm516_vm2, %v422_v36 }
  0x17   :  { %425 = vmatprep.subr.bf16.mxu1 %v473_v2 }
  0x1a   :  { %v56_v40 = vld [vmem:[#allocation2] sm:$0x3] }
  0x1b   :  { %v57_v41 = vmul.f32 0.125, %v56_v40 }
  0x1d   :  { %368 = vmatmul.mubr.msk.f32.vlgmr.msra.gmra.mrb[0].mxu0 %vm30_vm0, %v57_v41 }
  0x1e   :  { %428 = vmatpush3.bf16.xpose.msk.msra.mxu1 %vm516_vm2, %v426_v39 }
  0x1f   :  { %429 = vmatprep.subr.bf16.mxu1 %v473_v2 }
  0x26   :  { %432 = vmatpush3.bf16.xpose.msk.msra.mxu1 %vm516_vm2, %v430_v44 }
  0x27   :  { %433 = vmatprep.subr.bf16.mxu1 %v473_v2 }
  0x2e   :  { %436 = vmatpush3.bf16.xpose.msk.msra.mxu1 %vm516_vm2, %v434_v47 }
  0x2f   :  { %437 = vmatprep.subr.bf16.mxu1 %v473_v2 }
  0x36   :  { %440 = vmatpush3.bf16.xpose.msk.msra.mxu1 %vm516_vm2, %v438_v50 }
  0x37   :  { %441 = vmatprep.subr.bf16.mxu1 %v473_v2 }
  0x3e   :  { %444 = vmatpush3.bf16.xpose.msk.msra.mxu1 %vm516_vm2, %v442_v53 }
  0xf0   :  { %v150_v55 = vpop.f32.mrb[0].mxu0 }
  0xf1   :  { %v151_v56 = vadd.f32 %v313_v54, %v150_v55  ;;  %v369_v57 = vpop.f32.mrb[1].mxu0 }
  0xf3   :  { %403 = vmatmul.mubr.msk.f32.vlgmr.msra.gmra.mrb[0].mxu1 %vm30_vm0, %v151_v56 }
 0x1c6   :  { %v294_v59 = vpop.f32.mrb[0].mxu1 }
 0x1c7   :  { %v295_v60 = vadd.f32 %v319_v58, %v294_v59  ;;  %v404_v61 = vpop.f32.mrb[1].mxu1 }
 0x1c9   :  { %298 = vst [vmem:[#allocation3] sm:$0x3] %v295_v60 }
 0x1ca   :  { %460 = shalt.err (!%p457_p4)
}
 0x1cb   :  { %s461_s15 = scalar_lea.hbm %s638_s5, 32 }
 0x1cc   :  { %p462_p5 = scmp.ne.s32.totalorder %s638_s5, %s461_s15  ;;  %p465_p6 = scmp.lt.u32.totalorder %s461_s15, %s638_s5 }
 0x1ce   :  { %p467_p7 = pnand %p465_p6, %p462_p5 }
 0x1d0   :  { %470 = shalt.err (!%p467_p7)
}
 0x1d1   :  { %308 = dma.vmem_to_hbm [thread:$0]  %s306_s13, 32, %s638_s5, [#allocation4]  }
 0x1d2   :  { %471 = dma.done.wait [#allocation4], 32  }
 0x1d3   :  { %472 = vsyncadd [#allocation4], 4294967264 }
 0x1d4   :  { %312 = vsyncpa [#allocation4], 1 }

</bundles_post_ra>
